<compile_context>
chip_gen: v6e
topology: v6e:2x2x1
jax: 0.10.0
libtpu: 0.0.40
codegen_flags: <defaults>
</compile_context>

<pallas_src>
import functools
import math

import jax
import jax.numpy as jnp
from jax.experimental import pallas as pl
from jax.experimental.pallas import tpu as pltpu

EPS = 1e-5
NEG_INF = -1000000.0
MATMUL_DTYPE = jnp.bfloat16      # MXU operand dtype (f32 accumulation everywhere)

_VMEM_LIMIT = 48 << 20           # explicit scoped-VMEM limit for the fat kernels
_TILE_BUDGET = 28 << 20          # working-set budget used to pick row tile TM
_ATTN_BUDGET = 10 << 20          # working-set budget used to pick attention KB


def _round_up(a, m):
    return (a + m - 1) // m * m


def _cdiv(a, b):
    return -(-a // b)


def _pick_tm(M, footprint_fn, budget=_TILE_BUDGET, cap=512):
    """Row tile: minimal padding waste, >=2 grid steps (v7x megacore), VMEM-bounded."""
    n_tiles = max(1, _cdiv(M, cap))
    if M >= 16:
        n_tiles = max(n_tiles, 2)
    while True:
        tm = _round_up(_cdiv(M, n_tiles), 8)
        if tm <= 8 or footprint_fn(tm) <= budget:
            return max(tm, 8)
        n_tiles += 1


# --------------------------------------------------------------------------
# Kernel A: fused LayerNorm(norm1) + QKV projection  (row-tiled)
# --------------------------------------------------------------------------
def _ln_qkv_kernel(x_ref, g_ref, b_ref, w_ref, bias_ref, o_ref):
    x = x_ref[...].astype(jnp.float32)
    mean = jnp.mean(x, axis=-1, keepdims=True)
    var = jnp.mean(jnp.square(x - mean), axis=-1, keepdims=True)
    xn = (x - mean) * jax.lax.rsqrt(var + EPS) * g_ref[...] + b_ref[...]
    qkv = jnp.dot(xn.astype(MATMUL_DTYPE), w_ref[...],
                  preferred_element_type=jnp.float32) + bias_ref[...]
    o_ref[...] = qkv.astype(o_ref.dtype)


def _ln_qkv_footprint(tm, C):
    C3 = 3 * C
    return (2 * tm * C * 4           # x tile, f32, double-buffered
            + 2 * C * C3 * 2         # qkv weight, bf16, double-buffered
            + 2 * tm * C3 * 2        # out tile, bf16, double-buffered
            + tm * C3 * 4            # f32 matmul result
            + tm * C * 4)            # f32 normalized activations


def ln_qkv(x2d, gamma, beta, wqkv, bqkv):
    M, C = x2d.shape
    C3 = wqkv.shape[1]
    TM = _pick_tm(M, lambda tm: _ln_qkv_footprint(tm, C))
    Mp = _round_up(M, TM)
    if Mp != M:
        x2d = jnp.pad(x2d, ((0, Mp - M), (0, 0)))
    fp = _ln_qkv_footprint(TM, C)
    out = pl.pallas_call(
        _ln_qkv_kernel,
        out_shape=jax.ShapeDtypeStruct((Mp, C3), MATMUL_DTYPE),
        grid=(Mp // TM,),
        in_specs=[pl.BlockSpec((TM, C), lambda i: (i, 0)),
                  pl.BlockSpec((1, C), lambda i: (0, 0)),
                  pl.BlockSpec((1, C), lambda i: (0, 0)),
                  pl.BlockSpec((C, C3), lambda i: (0, 0)),
                  pl.BlockSpec((1, C3), lambda i: (0, 0))],
        out_specs=pl.BlockSpec((TM, C3), lambda i: (i, 0)),
        compiler_params=pltpu.CompilerParams(
            dimension_semantics=("parallel",),
            vmem_limit_bytes=_VMEM_LIMIT if fp > (24 << 20) else None),
    )(x2d, gamma, beta, wqkv, bqkv)
    return out[:M]


# --------------------------------------------------------------------------
# Kernel B: attention core (scores + bias [+ mask] + softmax + PV)
#           batched over (KB windows x num_heads) in one einsum batch dim.
#           K comes in pre-transposed as (..., hd, N).
# --------------------------------------------------------------------------
def _attn_body(q_ref, kt_ref, v_ref, bias_ref, mask_ref, o_ref, scale):
    _, KB, nh, N, hd = q_ref.shape
    q = q_ref[...].reshape(KB * nh, N, hd)
    kt = kt_ref[...].reshape(KB * nh, hd, N)
    v = v_ref[...].reshape(KB * nh, N, hd)
    # (g, N, hd) x (g, hd, N) -> (g, N, N), f32 accumulation on the MXU
    s = jnp.einsum('gnd,gdm->gnm', q, kt,
                   preferred_element_type=jnp.float32) * scale
    s = s.reshape(KB, nh, N, N) + bias_ref[...][None]
    if mask_ref is not None:
        s = s + mask_ref[0][None, None]
    s = s - jnp.max(s, axis=-1, keepdims=True)
    p = jnp.exp(s)
    p = p * pl.reciprocal(jnp.sum(p, axis=-1, keepdims=True), approx=False)
    p = p.reshape(KB * nh, N, N).astype(v.dtype)
    o = jnp.einsum('gnm,gmd->gnd', p, v, preferred_element_type=jnp.float32)
    o_ref[...] = o.reshape(o_ref.shape).astype(o_ref.dtype)


def _attn_kernel_nomask(q_ref, kt_ref, v_ref, bias_ref, o_ref, *, scale):
    _attn_body(q_ref, kt_ref, v_ref, bias_ref, None, o_ref, scale)


def _attn_kernel_mask(q_ref, kt_ref, v_ref, bias_ref, mask_ref, o_ref, *, scale):
    _attn_body(q_ref, kt_ref, v_ref, bias_ref, mask_ref, o_ref, scale)


def _pick_kb(B, nh, N, hd, nG, budget=_ATTN_BUDGET):
    best = 1
    for kb in range(1, B + 1):
        if B % kb:
            continue
        io = 4 * 2 * kb * nh * N * hd * 2          # q/kT/v/o, bf16, 2-buffered
        bias = 2 * nh * N * N * 4                  # resident relative-pos bias
        inter = kb * nh * N * N * (2 * 4 + 2)      # f32 scores + probs + bf16 copy
        if io + bias + inter > budget:
            break
        if nG * (B // kb) < 2 and nG * B >= 2:
            continue                               # keep >=2 grid steps (v7x 2 TCs)
        best = kb
    return best


def attention_core(q, kt, v, rel_bias, mask_g, mask_per_group, scale):
    nG, B, nh, N, hd = q.shape
    KB = _pick_kb(B, nh, N, hd, nG)
    qkv_map = lambda g, b: (g, b, 0, 0, 0)
    kt_spec = pl.BlockSpec((1, KB, nh, hd, N), qkv_map)
    common_specs = [pl.BlockSpec((1, KB, nh, N, hd), qkv_map),
                    kt_spec,
                    pl.BlockSpec((1, KB, nh, N, hd), qkv_map),
                    pl.BlockSpec((nh, N, N), lambda g, b: (0, 0, 0))]  # resident
    if mask_per_group:
        kernel = functools.partial(_attn_kernel_mask, scale=scale)
        in_specs = common_specs + [pl.BlockSpec((1, 1, N), lambda g, b: (g, 0, 0))]
        args = (q, kt, v, rel_bias, mask_g)
    else:
        kernel = functools.partial(_attn_kernel_nomask, scale=scale)
        in_specs = common_specs
        args = (q, kt, v, rel_bias)
    return pl.pallas_call(
        kernel,
        out_shape=jax.ShapeDtypeStruct((nG, B, nh, N, hd), q.dtype),
        grid=(nG, B // KB),                 # g slow -> bias/mask DMA reused
        in_specs=in_specs,
        out_specs=pl.BlockSpec((1, KB, nh, N, hd), qkv_map),
        compiler_params=pltpu.CompilerParams(
            dimension_semantics=("parallel", "parallel")),
    )(*args)


# --------------------------------------------------------------------------
# Kernel C: fused proj + residual + LayerNorm(norm2) + MLP + residual
# --------------------------------------------------------------------------
def _proj_mlp_kernel(a_ref, r_ref, wp_ref, bp_ref, g2_ref, b2_ref,
                     w1_ref, b1_ref, w2_ref, b2b_ref, o_ref):
    x1 = (r_ref[...].astype(jnp.float32)
          + jnp.dot(a_ref[...], wp_ref[...], preferred_element_type=jnp.float32)
          + bp_ref[...])
    mean = jnp.mean(x1, axis=-1, keepdims=True)
    var = jnp.mean(jnp.square(x1 - mean), axis=-1, keepdims=True)
    xn = (x1 - mean) * jax.lax.rsqrt(var + EPS) * g2_ref[...] + b2_ref[...]
    h = jnp.dot(xn.astype(MATMUL_DTYPE), w1_ref[...],
                preferred_element_type=jnp.float32) + b1_ref[...]
    h = jax.nn.gelu(h, approximate=False)      # exact GELU (nn.GELU default)
    y = jnp.dot(h.astype(MATMUL_DTYPE), w2_ref[...],
                preferred_element_type=jnp.float32) + b2b_ref[...]
    o_ref[...] = (x1 + y).astype(o_ref.dtype)


def _proj_mlp_footprint(tm, C, hidden):
    return (2 * tm * C * 2                              # attn in, bf16, 2-buf
            + 2 * tm * C * 4                            # shortcut, f32, 2-buf
            + 2 * (C * C + C * hidden + hidden * C) * 2  # resident bf16 weights
            + 2 * tm * C * 4                            # out, f32, 2-buf
            + tm * hidden * 4                           # f32 GELU intermediate
            + 2 * tm * C * 4)                           # f32 x1 / y intermediates


def proj_residual_mlp(attn2d, shortcut2d, params):
    M, C = shortcut2d.shape
    hidden = params['fc1_w'].shape[1]
    # TODO(synk): for very large C (hidden=4C) on v7x, tile the MLP hidden dim
    #             with a VMEM f32 accumulator instead of keeping fc1/fc2 resident.
    TM = _pick_tm(M, lambda tm: _proj_mlp_footprint(tm, C, hidden))
    Mp = _round_up(M, TM)
    if Mp != M:
        attn2d = jnp.pad(attn2d, ((0, Mp - M), (0, 0)))
        shortcut2d = jnp.pad(shortcut2d, ((0, Mp - M), (0, 0)))
    fp = _proj_mlp_footprint(TM, C, hidden)
    out = pl.pallas_call(
        _proj_mlp_kernel,
        out_shape=jax.ShapeDtypeStruct((Mp, C), shortcut2d.dtype),
        grid=(Mp // TM,),
        in_specs=[pl.BlockSpec((TM, C), lambda i: (i, 0)),
                  pl.BlockSpec((TM, C), lambda i: (i, 0)),
                  pl.BlockSpec((C, C), lambda i: (0, 0)),
                  pl.BlockSpec((1, C), lambda i: (0, 0)),
                  pl.BlockSpec((1, C), lambda i: (0, 0)),
                  pl.BlockSpec((1, C), lambda i: (0, 0)),
                  pl.BlockSpec((C, hidden), lambda i: (0, 0)),
                  pl.BlockSpec((1, hidden), lambda i: (0, 0)),
                  pl.BlockSpec((hidden, C), lambda i: (0, 0)),
                  pl.BlockSpec((1, C), lambda i: (0, 0))],
        out_specs=pl.BlockSpec((TM, C), lambda i: (i, 0)),
        compiler_params=pltpu.CompilerParams(
            dimension_semantics=("parallel",),
            vmem_limit_bytes=_VMEM_LIMIT if fp > (24 << 20) else None),
    )(attn2d, shortcut2d,
      params['proj_w'], params['proj_b'],
      params['norm2_g'], params['norm2_b'],
      params['fc1_w'], params['fc1_b'],
      params['fc2_w'], params['fc2_b'])
    return out[:M]


# --------------------------------------------------------------------------
# Plain-JAX glue: DynamicPosBias (tiny MLP) + relative position index
# --------------------------------------------------------------------------
def _ln(x, g, b):
    m = jnp.mean(x, -1, keepdims=True)
    v = jnp.mean(jnp.square(x - m), -1, keepdims=True)
    return (x - m) * jax.lax.rsqrt(v + EPS) * g + b


def dynamic_pos_bias(biases, p):
    # residual=False path of DynamicPosBias
    pos = biases @ p['proj_w'] + p['proj_b']
    pos = jax.nn.relu(_ln(pos, p['ln1_g'], p['ln1_b'])) @ p['fc1_w'] + p['fc1_b']
    pos = jax.nn.relu(_ln(pos, p['ln2_g'], p['ln2_b'])) @ p['fc2_w'] + p['fc2_b']
    pos = jax.nn.relu(_ln(pos, p['ln3_g'], p['ln3_b'])) @ p['fc3_w'] + p['fc3_b']
    return pos


def relative_position_bias(Gh, Gw, pos_params, num_heads):
    bh, bw = jnp.meshgrid(jnp.arange(1 - Gh, Gh), jnp.arange(1 - Gw, Gw),
                          indexing='ij')
    biases = jnp.stack([bh.reshape(-1), bw.reshape(-1)], axis=1).astype(jnp.float32)
    ch, cw = jnp.meshgrid(jnp.arange(Gh), jnp.arange(Gw), indexing='ij')
    coords = jnp.stack([ch.reshape(-1), cw.reshape(-1)])        # (2, N)
    rel = coords[:, :, None] - coords[:, None, :]               # (2, N, N)
    rel = rel.transpose(1, 2, 0)
    rel = rel.at[:, :, 0].add(Gh - 1)
    rel = rel.at[:, :, 1].add(Gw - 1)
    rel = rel.at[:, :, 0].multiply(2 * Gw - 1)
    idx = rel.sum(-1)                                           # (N, N)
    pos = dynamic_pos_bias(biases, pos_params)                  # ((2Gh-1)(2Gw-1), nh)
    rpb = pos[idx.reshape(-1)].reshape(Gh * Gw, Gh * Gw, num_heads)
    return rpb.transpose(2, 0, 1).astype(jnp.float32)           # (nh, N, N)


# --------------------------------------------------------------------------
# CrossFormer block / Stage forward
# --------------------------------------------------------------------------
def crossformer_block(x, H, W, params, cfg):
    B, L, C = x.shape
    assert L == H * W
    group_size, interval = cfg['group_size'], cfg['interval']
    lsda_flag, num_heads = cfg['lsda_flag'], cfg['num_heads']
    if min(H, W) <= group_size:
        lsda_flag = 0
        group_size = min(H, W)
    hd = C // num_heads
    scale = hd ** (-0.5)

    shortcut2d = x.reshape(B * L, C)

    size_div = interval if lsda_flag == 1 else group_size
    pad_r = (size_div - W % size_div) % size_div
    pad_b = (size_div - H % size_div) % size_div
    x4 = x.reshape(B, H, W, C)
    if pad_r or pad_b:
        x4 = jnp.pad(x4, ((0, 0), (0, pad_b), (0, pad_r), (0, 0)))
    Hp, Wp = H + pad_b, W + pad_r

    # ---- fused norm1 + QKV over all (padded) tokens (Kernel A) ----
    qkv = ln_qkv(x4.reshape(B * Hp * Wp, C), params['norm1_g'],
                 params['norm1_b'], params['qkv_w'], params['qkv_b'])
    qkv = qkv.reshape(B, Hp, Wp, 3, num_heads, hd)
    q_, k_, v_ = qkv[:, :, :, 0], qkv[:, :, :, 1], qkv[:, :, :, 2]  # (B,Hp,Wp,nh,hd)

    # ---- window partition + head-major layout (XLA transpose).  K is laid out
    #      pre-transposed (hd, N) so kernel B never transposes on the XLU. ----
    if lsda_flag == 0:                      # SDA
        G = group_size
        Gh = Gw = G
        Hb, Wb = Hp // G, Wp // G
        nG = Hb * Wb
        N = G * G

        def part(a):        # (B,Hp,Wp,nh,hd) -> (nG,B,nh,N,hd)
            t = a.reshape(B, Hb, G, Wb, G, num_heads, hd)
            return t.transpose(1, 3, 0, 5, 2, 4, 6).reshape(nG, B, num_heads, N, hd)

        def part_t(a):      # (B,Hp,Wp,nh,hd) -> (nG,B,nh,hd,N)
            t = a.reshape(B, Hb, G, Wb, G, num_heads, hd)
            return t.transpose(1, 3, 0, 5, 6, 2, 4).reshape(nG, B, num_heads, hd, N)
    else:                                   # LDA
        I = interval
        Gh, Gw = Hp // I, Wp // I
        nG = I * I
        N = Gh * Gw

        def part(a):
            t = a.reshape(B, Gh, I, Gw, I, num_heads, hd)
            return t.transpose(2, 4, 0, 5, 1, 3, 6).reshape(nG, B, num_heads, N, hd)

        def part_t(a):
            t = a.reshape(B, Gh, I, Gw, I, num_heads, hd)
            return t.transpose(2, 4, 0, 5, 6, 1, 3).reshape(nG, B, num_heads, hd, N)

    q = part(q_)
    kt = part_t(k_)
    v = part(v_)

    # ---- per-group padding mask over key positions (no broadcast to NxN) ----
    if pad_r or pad_b:
        m = jnp.zeros((1, Hp, Wp, 1), jnp.float32)
        if pad_b > 0:
            m = m.at[:, -pad_b:, :, :].set(-1.0)
        if pad_r > 0:
            m = m.at[:, :, -pad_r:, :].set(-1.0)
        if lsda_flag == 0:
            mg = (m.reshape(1, Hb, G, Wb, G, 1)
                    .transpose(0, 1, 3, 2, 4, 5).reshape(nG, 1, N))
        else:
            mg = (m.reshape(1, Gh, I, Gw, I, 1)
                    .transpose(0, 2, 4, 1, 3, 5).reshape(nG, 1, N))
        mask_g = jnp.where(mg < 0, NEG_INF, 0.0).astype(jnp.float32)
        mask_per_group = True
    else:
        mask_g = None
        mask_per_group = False

    rel_bias = relative_position_bias(Gh, Gw, params['pos'], num_heads)

    # ---- attention core (Kernel B) ----
    attn = attention_core(q, kt, v, rel_bias, mask_g, mask_per_group, scale)

    # ---- window reverse + head merge (XLA transpose), crop padding ----
    if lsda_flag == 0:
        t = attn.reshape(Hb, Wb, B, num_heads, G, G, hd)
        t = t.transpose(2, 0, 4, 1, 5, 3, 6)       # (B,Hb,G,Wb,G,nh,hd)
        xr = t.reshape(B, Hp, Wp, C)
    else:
        t = attn.reshape(I, I, B, num_heads, Gh, Gw, hd)
        t = t.transpose(2, 4, 0, 5, 1, 3, 6)       # (B,Gh,I,Gw,I,nh,hd)
        xr = t.reshape(B, Hp, Wp, C)
    xr = xr[:, :H, :W, :].reshape(B * H * W, C)

    # drop_path / dropout are identity (rate 0.0)
    # ---- fused proj + residual + norm2 + MLP + residual (Kernel C) ----
    out = proj_residual_mlp(xr, shortcut2d, params)
    return out.reshape(B, L, C)


def stage_forward(x, H, W, blocks_params, cfg):
    for i, bp in enumerate(blocks_params):
        blk_cfg = dict(cfg, lsda_flag=0 if i % 2 == 0 else 1)
        x = crossformer_block(x, H, W, bp, blk_cfg)
    B, _, C = x.shape
    feat = x.reshape(B, H, W, C).transpose(0, 3, 1, 2)   # NCHW, matches PyTorch
    # TODO(synk): downsample is None in this configuration (Stage default).
    return feat, x


# --------------------------------------------------------------------------
# Deterministic parameter init + one-time kernel-friendly preparation
# --------------------------------------------------------------------------
def init_block_params(key, dim, num_heads, mlp_ratio):
    # DynamicPosBias is constructed with dim//4, and its pos_dim = (dim//4)//4,
    # i.e. dim//16 — matches the reference parameter shapes.
    pd = (dim // 4) // 4
    hidden = int(dim * mlp_ratio)
    ks = jax.random.split(key, 8)

    def lin(k, fin, fout):
        return (jax.random.normal(k, (fin, fout), jnp.float32) * 0.02)

    return {
        'norm1_g': jnp.ones((dim,), jnp.float32),
        'norm1_b': jnp.zeros((dim,), jnp.float32),
        'qkv_w': lin(ks[0], dim, 3 * dim), 'qkv_b': jnp.zeros((3 * dim,), jnp.float32),
        'proj_w': lin(ks[1], dim, dim), 'proj_b': jnp.zeros((dim,), jnp.float32),
        'norm2_g': jnp.ones((dim,), jnp.float32),
        'norm2_b': jnp.zeros((dim,), jnp.float32),
        'fc1_w': lin(ks[2], dim, hidden), 'fc1_b': jnp.zeros((hidden,), jnp.float32),
        'fc2_w': lin(ks[3], hidden, dim), 'fc2_b': jnp.zeros((dim,), jnp.float32),
        'pos': {
            'proj_w': lin(ks[4], 2, pd), 'proj_b': jnp.zeros((pd,), jnp.float32),
            'ln1_g': jnp.ones((pd,), jnp.float32), 'ln1_b': jnp.zeros((pd,), jnp.float32),
            'fc1_w': lin(ks[5], pd, pd), 'fc1_b': jnp.zeros((pd,), jnp.float32),
            'ln2_g': jnp.ones((pd,), jnp.float32), 'ln2_b': jnp.zeros((pd,), jnp.float32),
            'fc2_w': lin(ks[6], pd, pd), 'fc2_b': jnp.zeros((pd,), jnp.float32),
            'ln3_g': jnp.ones((pd,), jnp.float32), 'ln3_b': jnp.zeros((pd,), jnp.float32),
            'fc3_w': lin(ks[7], pd, num_heads), 'fc3_b': jnp.zeros((num_heads,), jnp.float32),
        },
    }


def prepare_block_params(p):
    """One-time preparation: pre-cast matmul weights to bf16 and reshape biases
    so forward passes never re-cast / re-reshape weights in HBM."""
    dim = p['qkv_w'].shape[0]
    hidden = p['fc1_w'].shape[1]
    return {
        'norm1_g': p['norm1_g'].reshape(1, dim), 'norm1_b': p['norm1_b'].reshape(1, dim),
        'qkv_w': p['qkv_w'].astype(MATMUL_DTYPE), 'qkv_b': p['qkv_b'].reshape(1, 3 * dim),
        'proj_w': p['proj_w'].astype(MATMUL_DTYPE), 'proj_b': p['proj_b'].reshape(1, dim),
        'norm2_g': p['norm2_g'].reshape(1, dim), 'norm2_b': p['norm2_b'].reshape(1, dim),
        'fc1_w': p['fc1_w'].astype(MATMUL_DTYPE), 'fc1_b': p['fc1_b'].reshape(1, hidden),
        'fc2_w': p['fc2_w'].astype(MATMUL_DTYPE), 'fc2_b': p['fc2_b'].reshape(1, dim),
        'pos': p['pos'],
    }


if __name__ == "__main__":
    # Small, consistent config: dim=32, heads=4, group_size=4, interval=2,
    # depth=2 (block 0: SDA, block 1: LDA), H=W=8, B=2.
    B, H, W, C = 2, 8, 8, 32
    num_heads, group_size, interval, depth, mlp_ratio = 4, 4, 2, 2, 4.0

    key = jax.random.PRNGKey(0)
    kx, kp = jax.random.split(key)
    x = jax.random.normal(kx, (B, H * W, C), jnp.float32)
    block_keys = jax.random.split(kp, depth)
    blocks = [prepare_block_params(
        init_block_params(block_keys[i], C, num_heads, mlp_ratio))
        for i in range(depth)]
    blocks = jax.block_until_ready(blocks)   # weights pre-cast once, up front
    cfg = dict(group_size=group_size, interval=interval, num_heads=num_heads)

    feat, out = stage_forward(x, H, W, blocks, cfg)
    feat, out = jax.block_until_ready((feat, out))
    assert feat.shape == (B, C, H, W), feat.shape
    assert out.shape == (B, H * W, C), out.shape
    assert bool(jnp.all(jnp.isfinite(feat))) and bool(jnp.all(jnp.isfinite(out)))
    print("KERNEL_OK")
</pallas_src>

<mosaic_0001>
module attributes {stable_mosaic.version = 11 : i64} {
  func.func @_ln_qkv_kernel(%arg0: i32, %arg1: memref<64x32xf32, #tpu.memory_space<vmem>>, %arg2: memref<1x32xf32, #tpu.memory_space<vmem>>, %arg3: memref<1x32xf32, #tpu.memory_space<vmem>>, %arg4: memref<32x96xbf16, #tpu.memory_space<vmem>>, %arg5: memref<1x96xf32, #tpu.memory_space<vmem>>, %arg6: memref<64x96xbf16, #tpu.memory_space<vmem>>) attributes {dimension_semantics = [#tpu.dimension_semantics<parallel>], iteration_bounds = array<i64: 2>, scalar_prefetch = 0 : i64, scratch_operands = 0 : i64, tpu.core_type = #tpu.core_type<tc>, window_params = [{transform_indices = @transform_0, window_bounds = array<i64: 64, 32>}, {pipeline_mode = #tpu.pipeline_mode<synchronous>, transform_indices = @transform_1, window_bounds = array<i64: 1, 32>}, {pipeline_mode = #tpu.pipeline_mode<synchronous>, transform_indices = @transform_2, window_bounds = array<i64: 1, 32>}, {pipeline_mode = #tpu.pipeline_mode<synchronous>, transform_indices = @transform_3, window_bounds = array<i64: 32, 96>}, {pipeline_mode = #tpu.pipeline_mode<synchronous>, transform_indices = @transform_4, window_bounds = array<i64: 1, 96>}, {transform_indices = @transform_5, window_bounds = array<i64: 64, 96>}]} {
    %c0 = arith.constant 0 : index
    %c0_0 = arith.constant 0 : index
    %0 = vector.load %arg1[%c0, %c0_0] : memref<64x32xf32, #tpu.memory_space<vmem>>, vector<64x32xf32>
    %cst = arith.constant dense<0.000000e+00> : vector<64xf32>
    %1 = vector.multi_reduction <add>, %0, %cst [1] : vector<64x32xf32> to vector<64xf32>
    %2 = vector.shape_cast %1 : vector<64xf32> to vector<64x1xf32>
    %cst_1 = arith.constant 3.200000e+01 : f32
    %3 = vector.broadcast %cst_1 : f32 to vector<64x1xf32>
    %4 = arith.divf %2, %3 : vector<64x1xf32>
    %5 = vector.broadcast %4 : vector<64x1xf32> to vector<64x32xf32>
    %6 = arith.subf %0, %5 : vector<64x32xf32>
    %7 = arith.mulf %6, %6 : vector<64x32xf32>
    %cst_2 = arith.constant dense<0.000000e+00> : vector<64xf32>
    %8 = vector.multi_reduction <add>, %7, %cst_2 [1] : vector<64x32xf32> to vector<64xf32>
    %9 = vector.shape_cast %8 : vector<64xf32> to vector<64x1xf32>
    %cst_3 = arith.constant 3.200000e+01 : f32
    %10 = vector.broadcast %cst_3 : f32 to vector<64x1xf32>
    %11 = arith.divf %9, %10 : vector<64x1xf32>
    %12 = vector.broadcast %4 : vector<64x1xf32> to vector<64x32xf32>
    %13 = arith.subf %0, %12 : vector<64x32xf32>
    %cst_4 = arith.constant 9.99999974E-6 : f32
    %14 = vector.broadcast %cst_4 : f32 to vector<64x1xf32>
    %15 = arith.addf %11, %14 : vector<64x1xf32>
    %16 = math.rsqrt %15 : vector<64x1xf32>
    %17 = vector.broadcast %16 : vector<64x1xf32> to vector<64x32xf32>
    %18 = arith.mulf %13, %17 : vector<64x32xf32>
    %c0_5 = arith.constant 0 : index
    %c0_6 = arith.constant 0 : index
    %19 = vector.load %arg2[%c0_5, %c0_6] : memref<1x32xf32, #tpu.memory_space<vmem>>, vector<1x32xf32>
    %20 = vector.broadcast %19 : vector<1x32xf32> to vector<64x32xf32>
    %21 = arith.mulf %18, %20 : vector<64x32xf32>
    %c0_7 = arith.constant 0 : index
    %c0_8 = arith.constant 0 : index
    %22 = vector.load %arg3[%c0_7, %c0_8] : memref<1x32xf32, #tpu.memory_space<vmem>>, vector<1x32xf32>
    %23 = vector.broadcast %22 : vector<1x32xf32> to vector<64x32xf32>
    %24 = arith.addf %21, %23 : vector<64x32xf32>
    %25 = arith.truncf %24 : vector<64x32xf32> to vector<64x32xbf16>
    %c0_9 = arith.constant 0 : index
    %c0_10 = arith.constant 0 : index
    %26 = vector.load %arg4[%c0_9, %c0_10] : memref<32x96xbf16, #tpu.memory_space<vmem>>, vector<32x96xbf16>
    %cst_11 = arith.constant dense<0.000000e+00> : vector<64x96xf32>
    %27 = tpu.matmul %25, %26, %cst_11 {dimension_numbers = #tpu.dot_dimension_numbers<[1], [0], [0], [1], [0, 0, 1, 1], [], []>} : vector<64x32xbf16>, vector<32x96xbf16>, vector<64x96xf32> -> vector<64x96xf32>
    %c0_12 = arith.constant 0 : index
    %c0_13 = arith.constant 0 : index
    %28 = vector.load %arg5[%c0_12, %c0_13] : memref<1x96xf32, #tpu.memory_space<vmem>>, vector<1x96xf32>
    %29 = vector.broadcast %28 : vector<1x96xf32> to vector<64x96xf32>
    %30 = arith.addf %27, %29 : vector<64x96xf32>
    %31 = arith.truncf %30 : vector<64x96xf32> to vector<64x96xbf16>
    %c0_14 = arith.constant 0 : index
    %c0_15 = arith.constant 0 : index
    %32 = vector.load %arg6[%c0_14, %c0_15] : memref<64x96xbf16, #tpu.memory_space<vmem>>, vector<64x96xbf16>
    tpu.vector_store %arg6[%c0_14, %c0_15], %31 {strides = array<i32>} : memref<64x96xbf16, #tpu.memory_space<vmem>>, vector<64x96xbf16>,
    return
  }
  func.func @transform_0(%arg0: i32) -> (i32, i32) {
    %c0_i32 = arith.constant 0 : i32
    %c0_i32_0 = arith.constant 0 : i32
    return %arg0, %c0_i32 : i32, i32
  }
  func.func @transform_1(%arg0: i32) -> (i32, i32) {
    %c0_i32 = arith.constant 0 : i32
    %c0_i32_0 = arith.constant 0 : i32
    %c0_i32_1 = arith.constant 0 : i32
    return %c0_i32, %c0_i32_0 : i32, i32
  }
  func.func @transform_2(%arg0: i32) -> (i32, i32) {
    %c0_i32 = arith.constant 0 : i32
    %c0_i32_0 = arith.constant 0 : i32
    %c0_i32_1 = arith.constant 0 : i32
    return %c0_i32, %c0_i32_0 : i32, i32
  }
  func.func @transform_3(%arg0: i32) -> (i32, i32) {
    %c0_i32 = arith.constant 0 : i32
    %c0_i32_0 = arith.constant 0 : i32
    %c0_i32_1 = arith.constant 0 : i32
    return %c0_i32, %c0_i32_0 : i32, i32
  }
  func.func @transform_4(%arg0: i32) -> (i32, i32) {
    %c0_i32 = arith.constant 0 : i32
    %c0_i32_0 = arith.constant 0 : i32
    %c0_i32_1 = arith.constant 0 : i32
    return %c0_i32, %c0_i32_0 : i32, i32
  }
  func.func @transform_5(%arg0: i32) -> (i32, i32) {
    %c0_i32 = arith.constant 0 : i32
    %c0_i32_0 = arith.constant 0 : i32
    return %arg0, %c0_i32 : i32, i32
  }
}

</mosaic_0001>

<bundles_post_ra>
// kernel: tpu_custom_call.1
= control target key start
LH: loop header
LB: loop body
LE: loop exit
PB: predicated region body
PF: predicated region fallthrough
CT: control target
= control target key end

     0   :  { %s696_s18 = smov 0   ;;  %s810_s0 = inlined_call_operand.vmem [shape: f32[128,32], index: 0, kind: input, shape index: {}]   ;;  %s811_s1 = inlined_call_operand.vmem [shape: f32[1,32], index: 1, kind: input, shape index: {}]   ;;  %s812_s2 = inlined_call_operand.vmem [shape: f32[1,32], index: 2, kind: input, shape index: {}]   ;;  %s813_s3 = inlined_call_operand.vmem [shape: bf16[32,96], index: 3, kind: input, shape index: {}]   ;;  %s814_s4 = inlined_call_operand.vmem [shape: f32[1,96], index: 4, kind: input, shape index: {}]   ;;  %s815_s5 = inlined_call_operand.vmem [shape: bf16[128,96], index: 5, kind: output, shape index: {}]  }
   0x1 LB: > { %s574_s19 = sadd.s32 4294967295, %s664_s18   ;;  %p578_p0 = scmp.ge.s32.totalorder %s664_s18, 1  ;;  %s664_s18 = sphi %s696_s18, %s15_s18  }
   0x2   : > { %p188_p1 = scmp.lt.s32.totalorder %s664_s18, 3 }
   0x4   : > { %p189_p2 = pnand %p578_p0, %p188_p1 }
   0x5   : > { %s579_s20 = sshll.u32 (!%p189_p2), %s574_s19, 3 }
   0x6   : > { %192 = sbr.rel (%p189_p2) target bundleno = 545 (0x221), region = 40  ;;  %p217_p3 = scmp.lt.s32.totalorder (!%p189_p2), %s579_s20, 15 }
   0xb   : > { %s817_s20 = smov (!%p217_p3, %s579_s20), 15  ;;  %vm237_vm0 = vcmask 261120   ;;  %v640_v56 = vld [vmem:[%s813_s3 + $0x8] sm:$0xff]   ;;  %v641_v57 = vld [vmem:[%s813_s3] sm:$0xff]   ;;  %vm509_vm1 = vcmask 781312  }
   0xc   : > { %s580_s21 = sshll.u32 %s817_s20, 3  ;;  %616 = vmatprep.subr.bf16.mxu0 %v640_v56  ;;  %628 = vmatprep.subr.bf16.mxu1 %v640_v56  ;;  %s582_s10 = sshll.u32 %s817_s20, 2 }
   0xd   : > { %s220_s24 = scalar_lea.vmem %s810_s0, %s580_s21  ;;  %617 = vmatpush3.bf16.msra.mxu0 %v640_v56  ;;  %630 = vmatpush3.bf16.msra.mxu1 %v640_v56  ;;  %s789_s13 = scalar_lea.vmem %s815_s5, %s582_s10 }
   0xe   : > { %v229_v0 = vld [vmem:[%s220_s24] sm:$0xff]  ;;  %v230_v2 = vld [vmem:[%s220_s24 + $0x8] sm:$0xff]  ;;  %v231_v8 = vld [vmem:[%s220_s24 + $0x10] sm:$0xff]  ;;  %618 = vmatprep.subr.bf16.mxu0 %v641_v57  ;;  %629 = vmatprep.subr.bf16.mxu1 %v641_v57 }
   0xf   : > { %v233_v1 = vld [vmem:[%s220_s24 + $0x20] sm:$0xff]  ;;  %v238_v3 = vsel %vm237_vm0, %v229_v0, 0.0  ;;  %v234_v5 = vld [vmem:[%s220_s24 + $0x28] sm:$0xff]  ;;  %v241_v6 = vsel %vm237_vm0, %v230_v2, 0.0  ;;  %v232_v9 = vld [vmem:[%s220_s24 + $0x18] sm:$0xff]  ;;  %v244_v10 = vsel %vm237_vm0, %v231_v8, 0.0 }
  0x10   : > { %v250_v4 = vsel %vm237_vm0, %v233_v1, 0.0  ;;  %239 = vadd.xlane.f32.xlu0 %v238_v3  ;;  %v253_v7 = vsel %vm237_vm0, %v234_v5, 0.0  ;;  %v247_v11 = vsel %vm237_vm0, %v232_v9, 0.0  ;;  %v235_v12 = vld [vmem:[%s220_s24 + $0x30] sm:$0xff]  ;;  %v236_v13 = vld [vmem:[%s220_s24 + $0x38] sm:$0xff] }
  0x11   : > { %251 = vadd.xlane.f32.xlu1 %v250_v4  ;;  %v256_v14 = vsel %vm237_vm0, %v235_v12, 0.0  ;;  %v259_v15 = vsel %vm237_vm0, %v236_v13, 0.0  ;;  %619 = vmatpush3.bf16.msra.mxu0 %v641_v57 }
  0x12   : > { %631 = vmatpush3.bf16.msra.mxu1 %v641_v57 }
  0x14   : > { %242 = vadd.xlane.f32.xlu0 %v241_v6 }
  0x15   : > { %254 = vadd.xlane.f32.xlu1 %v253_v7 }
  0x18   : > { %245 = vadd.xlane.f32.xlu0 %v244_v10 }
  0x19   : > { %248 = vadd.xlane.f32.xlu1 %v247_v11 }
  0x1c   : > { %257 = vadd.xlane.f32.xlu0 %v256_v14 }
  0x1d   : > { %260 = vadd.xlane.f32.xlu1 %v259_v15 }
  0x99   : > { %v240_v16 = vpop.xlane.xlu0 %239 }
  0x9a   : > { %v252_v17 = vpop.xlane.xlu1 %251  ;;  %v263_v18 = vmul.f32 0.03125, %v240_v16 }
  0x9b   : > { %v267_v19 = vmul.f32 0.03125, %v252_v17 }
  0x9c   : > { %v718_v20 = vsub.f32 %v229_v0, %v263_v18 }
  0x9d   : > { %v720_v21 = vsub.f32 %v233_v1, %v267_v19  ;;  %v243_v22 = vpop.xlane.xlu0 %242 }
  0x9e   : > { %v255_v23 = vpop.xlane.xlu1 %254  ;;  %v264_v24 = vmul.f32 0.03125, %v243_v22  ;;  %v279_v26 = vmul.f32 %v718_v20, %v718_v20  ;;  %v583_v22 = vld [vmem:[%s811_s1] ss:$0 sm:$0xff] }
  0x9f   : > { %v268_v25 = vmul.f32 0.03125, %v255_v23  ;;  %v283_v27 = vmul.f32 %v720_v21, %v720_v21 }
  0xa0   : > { %v726_v28 = vsub.f32 %v230_v2, %v264_v24  ;;  %v287_v30 = vsel %vm237_vm0, %v279_v26, 0.0 }
  0xa1   : > { %v728_v29 = vsub.f32 %v234_v5, %v268_v25  ;;  %288 = vadd.xlane.f32.xlu0 %v287_v30  ;;  %v246_v31 = vpop.xlane.xlu0 %245  ;;  %v299_v33 = vsel %vm237_vm0, %v283_v27, 0.0  ;;  %v584_v27 = vld [vmem:[%s812_s2] ss:$0 sm:$0xff] }
  0xa2   : > { %v249_v32 = vpop.xlane.xlu1 %248  ;;  %v265_v34 = vmul.f32 0.03125, %v246_v31  ;;  %v280_v36 = vmul.f32 %v726_v28, %v726_v28 }
  0xa3   : > { %v266_v35 = vmul.f32 0.03125, %v249_v32  ;;  %v284_v37 = vmul.f32 %v728_v29, %v728_v29 }
  0xa4   : > { %v736_v38 = vsub.f32 %v231_v8, %v265_v34  ;;  %v290_v40 = vsel %vm237_vm0, %v280_v36, 0.0 }
  0xa5   : > { %v738_v39 = vsub.f32 %v232_v9, %v266_v35  ;;  %300 = vadd.xlane.f32.xlu0 %v299_v33  ;;  %291 = vadd.xlane.f32.xlu1 %v290_v40  ;;  %v258_v41 = vpop.xlane.xlu0 %257  ;;  %v302_v43 = vsel %vm237_vm0, %v284_v37, 0.0 }
  0xa6   : > { %v261_v42 = vpop.xlane.xlu1 %260  ;;  %v269_v44 = vmul.f32 0.03125, %v258_v41  ;;  %v281_v46 = vmul.f32 %v736_v38, %v736_v38 }
  0xa7   : > { %v270_v45 = vmul.f32 0.03125, %v261_v42  ;;  %v282_v47 = vmul.f32 %v738_v39, %v738_v39 }
  0xa8   : > { %v746_v48 = vsub.f32 %v235_v12, %v269_v44  ;;  %v293_v50 = vsel %vm237_vm0, %v281_v46, 0.0 }
  0xa9   : > { %v748_v49 = vsub.f32 %v236_v13, %v270_v45  ;;  %303 = vadd.xlane.f32.xlu1 %v302_v43  ;;  %294 = vadd.xlane.f32.xlu0 %v293_v50  ;;  %v296_v51 = vsel %vm237_vm0, %v282_v47, 0.0 }
  0xaa   : > { %v285_v52 = vmul.f32 %v746_v48, %v746_v48 }
  0xab   : > { %v286_v53 = vmul.f32 %v748_v49, %v748_v49 }
  0xac   : > { %v305_v54 = vsel %vm237_vm0, %v285_v52, 0.0 }
  0xad   : > { %297 = vadd.xlane.f32.xlu1 %v296_v51  ;;  %306 = vadd.xlane.f32.xlu0 %v305_v54  ;;  %v308_v55 = vsel %vm237_vm0, %v286_v53, 0.0 }
  0xb1   : > { %309 = vadd.xlane.f32.xlu1 %v308_v55 }
 0x12a   : > { %v289_v58 = vpop.xlane.xlu0 %288 }
 0x12b   : > { %v311_v59 = vmul.f32 0.03125, %v289_v58 }
 0x12d   : > { %v319_v60 = vadd.f32 1e-05, %v311_v59 }
 0x12e   : > { %v292_v61 = vpop.xlane.xlu1 %291  ;;  %v301_v62 = vpop.xlane.xlu0 %300 }
 0x12f   : > { %642 = vrsqrt.f32 %v319_v60  ;;  %v312_v63 = vmul.f32 0.03125, %v292_v61  ;;  %v315_v0 = vmul.f32 0.03125, %v301_v62 }
 0x131   : > { %v320_v1 = vadd.f32 1e-05, %v312_v63  ;;  %v323_v2 = vadd.f32 1e-05, %v315_v0 }
 0x132   : > { %v304_v3 = vpop.xlane.xlu1 %303  ;;  %v295_v4 = vpop.xlane.xlu0 %294 }
 0x133   : > { %644 = vrsqrt.f32 %v320_v1  ;;  %v316_v5 = vmul.f32 0.03125, %v304_v3  ;;  %v313_v6 = vmul.f32 0.03125, %v295_v4 }
 0x134   : > { %646 = vrsqrt.f32 %v323_v2 }
 0x135   : > { %v324_v7 = vadd.f32 1e-05, %v316_v5  ;;  %v321_v8 = vadd.f32 1e-05, %v313_v6 }
 0x136   : > { %v298_v9 = vpop.xlane.xlu1 %297  ;;  %v307_v10 = vpop.xlane.xlu0 %306 }
 0x137   : > { %648 = vrsqrt.f32 %v324_v7  ;;  %v314_v11 = vmul.f32 0.03125, %v298_v9  ;;  %v317_v12 = vmul.f32 0.03125, %v307_v10 }
 0x138   : > { %650 = vrsqrt.f32 %v321_v8 }
 0x139   : > { %v322_v13 = vadd.f32 1e-05, %v314_v11  ;;  %v325_v14 = vadd.f32 1e-05, %v317_v12 }
 0x13a   : > { %v310_v15 = vpop.xlane.xlu1 %309 }
 0x13b   : > { %652 = vrsqrt.f32 %v322_v13  ;;  %v318_v16 = vmul.f32 0.03125, %v310_v15 }
 0x13c   : > { %v643_v17 = vpop.eup %642  ;;  %654 = vrsqrt.f32 %v325_v14 }
 0x13d   : > { %v326_v18 = vadd.f32 1e-05, %v318_v16  ;;  %v335_v19 = vmul.f32 %v643_v17, %v718_v20 }
 0x13f   : > { %656 = vrsqrt.f32 %v326_v18  ;;  %v350_v26 = vmul.f32 %v583_v22, %v335_v19 }
 0x140   : > { %v645_v23 = vpop.eup %644 }
 0x141   : > { %v647_v24 = vpop.eup %646  ;;  %v336_v25 = vmul.f32 %v645_v23, %v726_v28  ;;  %v365_v20 = vadd.f32 %v584_v27, %v350_v26 }
 0x142   : > { %v339_v30 = vmul.f32 %v647_v24, %v720_v21 }
 0x143   : > { %v351_v31 = vmul.f32 %v583_v22, %v336_v25 }
 0x144   : > { %v649_v32 = vpop.eup %648  ;;  %v354_v36 = vmul.f32 %v583_v22, %v339_v30 }
 0x145   : > { %v651_v33 = vpop.eup %650  ;;  %v366_v34 = vadd.f32 %v584_v27, %v351_v31  ;;  %v340_v35 = vmul.f32 %v649_v32, %v728_v29 }
 0x146   : > { %v337_v37 = vmul.f32 %v651_v33, %v736_v38  ;;  %v369_v43 = vadd.f32 %v584_v27, %v354_v36 }
 0x147   : > { %v373_v40 = vpack.c.bf16 %v366_v34, %v365_v20  ;;  %v355_v41 = vmul.f32 %v583_v22, %v340_v35 }
 0x148   : > { %v653_v28 = vpop.eup %652  ;;  %v352_v45 = vmul.f32 %v583_v22, %v337_v37 }
 0x149   : > { %v655_v42 = vpop.eup %654  ;;  %620 = vmatprep.mubr.msk.bf16.mxu0 %vm237_vm0, %v373_v40  ;;  %v370_v44 = vadd.f32 %v584_v27, %v355_v41  ;;  %v338_v21 = vmul.f32 %v653_v28, %v738_v39 }
 0x14a   : > { %v341_v46 = vmul.f32 %v655_v42, %v746_v48  ;;  %v367_v38 = vadd.f32 %v584_v27, %v352_v45  ;;  %v585_v48 = vld [vmem:[%s814_s4] ss:$0 sm:$0xff] }
 0x14b   : > { %v375_v47 = vpack.c.bf16 %v370_v44, %v369_v43  ;;  %v353_v50 = vmul.f32 %v583_v22, %v338_v21 }
 0x14c   : > { %v657_v29 = vpop.eup %656  ;;  %v356_v53 = vmul.f32 %v583_v22, %v341_v46 }
 0x14d   : > { %624 = vmatprep.mubr.msk.bf16.mxu1 %vm237_vm0, %v375_v47  ;;  %v368_v51 = vadd.f32 %v584_v27, %v353_v50  ;;  %v342_v52 = vmul.f32 %v657_v29, %v748_v49 }
 0x14e   : > { %v371_v56 = vadd.f32 %v584_v27, %v356_v53 }
 0x14f   : > { %v374_v54 = vpack.c.bf16 %v368_v51, %v367_v38  ;;  %v357_v55 = vmul.f32 %v583_v22, %v342_v52 }
 0x151   : > { %621 = vmatmul.mubr.msk.bf16.vlgmr.msra.gmra.mxu0 %vm237_vm0, %v374_v54  ;;  %v372_v39 = vadd.f32 %v584_v27, %v357_v55 }
 0x153   : > { %v376_v57 = vpack.c.bf16 %v372_v39, %v371_v56 }
 0x155   : > { %625 = vmatmul.mubr.msk.bf16.vlgmr.msra.gmra.mxu1 %vm237_vm0, %v376_v57 }
 0x211   : > { %v622_v58 = vpop.f32.mrf.mxu0 }
 0x212   : > { %v455_v59 = vadd.f32 %v622_v58, %v585_v48 }
 0x213   : > { %v446_v49 = vpop.f32.mrf.mxu0 }
 0x214   : > { %v604_v60 = vpack.c.bf16 %v455_v59, %v455_v59  ;;  %v447_v61 = vadd.f32 %v585_v48, %v446_v49 }
 0x215   : > { %v623_v62 = vpop.f32.mrf.mxu0  ;;  %v626_v63 = vpop.f32.mrf.mxu1 }
 0x216   : > { %512 = vst.msk [vmem:[%s789_s13 + $0x8] sm:$0xf] %vm509_vm1, %v604_v60  ;;  %v602_v0 = vpack.c.bf16 %v447_v61, %v447_v61  ;;  %v458_v1 = vadd.f32 %v623_v62, %v585_v48  ;;  %v471_v2 = vadd.f32 %v626_v63, %v585_v48 }
 0x217   : > { %v449_v3 = vpop.f32.mrf.mxu0  ;;  %v462_v4 = vpop.f32.mrf.mxu1 }
 0x218   : > { %510 = vst.msk [vmem:[%s789_s13] sm:$0xf] %vm509_vm1, %v602_v0  ;;  %v605_v5 = vpack.c.bf16 %v458_v1, %v458_v1  ;;  %v608_v6 = vpack.c.bf16 %v471_v2, %v471_v2  ;;  %v450_v7 = vadd.f32 %v585_v48, %v449_v3  ;;  %v463_v8 = vadd.f32 %v585_v48, %v462_v4 }
 0x219   : > { %v627_v9 = vpop.f32.mrf.mxu1 }
 0x21a   : > { %513 = vst.msk [vmem:[%s789_s13 + $0xc] sm:$0xf] %vm509_vm1, %v605_v5  ;;  %516 = vst.msk [vmem:[%s789_s13 + $0x18] sm:$0xf] %vm509_vm1, %v608_v6  ;;  %v603_v10 = vpack.c.bf16 %v450_v7, %v450_v7  ;;  %v606_v11 = vpack.c.bf16 %v463_v8, %v463_v8  ;;  %v474_v12 = vadd.f32 %v627_v9, %v585_v48 }
 0x21b   : > { %v465_v13 = vpop.f32.mrf.mxu1 }
 0x21c   : > { %511 = vst.msk [vmem:[%s789_s13 + $0x4] sm:$0xf] %vm509_vm1, %v603_v10  ;;  %514 = vst.msk [vmem:[%s789_s13 + $0x10] sm:$0xf] %vm509_vm1, %v606_v11  ;;  %v609_v14 = vpack.c.bf16 %v474_v12, %v474_v12  ;;  %v466_v15 = vadd.f32 %v585_v48, %v465_v13 }
 0x21e   : > { %517 = vst.msk [vmem:[%s789_s13 + $0x1c] sm:$0xf] %vm509_vm1, %v609_v14  ;;  %v607_v16 = vpack.c.bf16 %v466_v15, %v466_v15 }
 0x220   : > { %515 = vst.msk [vmem:[%s789_s13 + $0x14] sm:$0xf] %vm509_vm1, %v607_v16 }
 0x221 PF: > { %s15_s18 = sadd.s32 1, %s664_s18  }
 0x222   : > { %p12_p4 = scmp.ge.s32.totalorder %s15_s18, 4  }
 0x224   :  { %14 = sbr.rel (!%p12_p4) target bundleno = 1 (0x1), region = 70 }

</bundles_post_ra>
